<compile_context>
chip_gen: v7x
topology: tpu7x:2x2x1
jax: 0.10.0
libtpu: 0.0.40
codegen_flags: <defaults>
</compile_context>

<pallas_src>
import jax
import jax.numpy as jnp
from jax.experimental import pallas as pl
from jax.experimental.pallas import tpu as pltpu

# Original torch module layer chain: (in, out, relu_after)
LAYERS = [
    (64, 32, True),   # encoder Linear(64,32) + ReLU
    (32, 16, True),   # encoder Linear(32,16) + ReLU
    (16, 8,  False),  # encoder Linear(16,8)           (no ReLU on bottleneck)
    (8,  16, True),   # decoder Linear(8,16)  + ReLU
    (16, 32, True),   # decoder Linear(16,32) + ReLU
    (32, 64, True),   # decoder Linear(32,64) + ReLU
]

# After exactly folding layers 3&4 (no nonlinearity between them):
FOLDED_LAYERS = [
    (64, 32, True),
    (32, 16, True),
    (16, 16, True),   # = Linear(16,8) @ Linear(8,16), ReLU from the decoder side
    (16, 32, True),
    (32, 64, True),
]

_ALIGN = 32  # row alignment: bt//2 is a multiple of 16 sublanes (f32 & bf16 safe)


def _round_up(x, m):
    return ((x + m - 1) // m) * m


def _ae_kernel(x_ref, w1_ref, w2_ref, w3_ref, w4_ref, w5_ref, b_ref, o_ref):
    """Fused forward on one lane-dense batch tile.

    x_ref/o_ref: (bt//2, 128) -- each 128-lane row holds two consecutive batch rows.
    w*_ref:      block-diagonal doubled weights (2*din, 2*dout), resident in VMEM.
    b_ref:       (8, 128) packed (doubled) biases, f32.
    """
    w_refs = (w1_ref, w2_ref, w3_ref, w4_ref, w5_ref)
    h = x_ref[...]
    for li, (_, dout, relu) in enumerate(FOLDED_LAYERS):
        w = w_refs[li][...]
        b = b_ref[li:li + 1, : 2 * dout].astype(jnp.float32)        # (1, 2*dout)
        h = jnp.dot(h.astype(w.dtype), w,
                    preferred_element_type=jnp.float32) + b
        if relu:
            h = jnp.maximum(h, 0.0)
    o_ref[...] = h.astype(o_ref.dtype)


def prepare_params(params, dtype=jnp.float32):
    """Hoisted (call ONCE): fold the bottleneck pair, build block-diagonal doubled
    weights, pack the five biases into one (8,128) f32 slab."""
    w1, b1, w2, b2, w3, b3, w4, b4, w5, b5, w6, b6 = params
    # Exact fold (no nonlinearity between layer 3 and layer 4).
    w34 = w3 @ w4
    b34 = b3 @ w4 + b4
    ws = [w1, w2, w34, w5, w6]
    bs = [b1, b2, b34, b5, b6]

    ws_doubled = []
    b_packed = jnp.zeros((8, 128), jnp.float32)
    for li, (w, b) in enumerate(zip(ws, bs)):
        din, dout = w.shape
        wd = jnp.zeros((2 * din, 2 * dout), jnp.float32)
        wd = wd.at[:din, :dout].set(w).at[din:, dout:].set(w)   # blkdiag(W, W)
        ws_doubled.append(wd.astype(dtype))
        b_packed = b_packed.at[li, : 2 * dout].set(
            jnp.concatenate([b[0], b[0]]))
    return ws_doubled, b_packed   # biases stay f32 (bias add / ReLU done in f32)


def _run_tiles(x_even, ws, b_packed, bt, vmem_limit):
    """x_even: (N, 64) with N % bt == 0, bt % 32 == 0.  Zero-copy lane-dense view."""
    N = x_even.shape[0]
    assert N % bt == 0 and bt % _ALIGN == 0 and N > 0
    x2 = x_even.reshape(N // 2, 128)   # two batch rows per 128-lane row (free view)

    in_specs = [pl.BlockSpec((bt // 2, 128), lambda i: (i, 0))]
    for w in ws:                                   # full-block, resident weights
        in_specs.append(pl.BlockSpec(w.shape, lambda i: (0, 0)))
    in_specs.append(pl.BlockSpec((8, 128), lambda i: (0, 0)))   # packed biases
    out_spec = pl.BlockSpec((bt // 2, 128), lambda i: (i, 0))

    out2 = pl.pallas_call(
        _ae_kernel,
        out_shape=jax.ShapeDtypeStruct((N // 2, 128), x_even.dtype),
        grid_spec=pltpu.PrefetchScalarGridSpec(
            num_scalar_prefetch=0,
            grid=(N // bt,),
            in_specs=in_specs,
            out_specs=out_spec,
        ),
        compiler_params=pltpu.CompilerParams(
            dimension_semantics=("parallel",),   # shards batch tiles across v7x TCs
            vmem_limit_bytes=vmem_limit,
        ),
    )(x2, *ws, b_packed)
    return out2.reshape(N, 64)


def autoencoder_forward(x, prepared, *, batch_tile=None, io_dtype=None):
    """x: [B, 64].  prepared: result of prepare_params(params) (hoisted).
    io_dtype: activation I/O dtype (bf16 halves the HBM traffic; output is
    returned in this dtype)."""
    ws, b_packed = prepared
    B, D_in = x.shape
    assert D_in == 64

    if io_dtype is not None and x.dtype != jnp.dtype(io_dtype):
        x = x.astype(io_dtype)     # prefer feeding io_dtype directly to skip this pass
    io_dtype = x.dtype

    # Dtype-aware tile: big enough to amortize the ~0.35 us per-step overhead.
    if batch_tile is None:
        batch_tile = 8192 if io_dtype == jnp.bfloat16 else 4096

    Bp = _round_up(B, _ALIGN)
    bt = max(_ALIGN, min(_round_up(batch_tile, _ALIGN), Bp))
    if Bp >= 2 * _ALIGN:
        # Ensure >= 2 grid steps so both v7x TensorCores get work.
        bt = min(bt, _round_up(Bp // 2, _ALIGN))

    # VMEM budget: in+out blocks (double-buffered) + resident weights/biases.
    itemsize = jnp.dtype(io_dtype).itemsize
    blk_bytes = (bt // 2) * 128 * itemsize
    w_bytes = sum(int(w.size) * w.dtype.itemsize for w in ws) + 8 * 128 * 4
    vmem_limit = int(min(max(2 * (4 * blk_bytes + 2 * w_bytes), 32 << 20), 64 << 20))

    B_main = (B // bt) * bt
    if B_main == B:
        # Fast path: no padding, no slicing -- pure streaming.
        return _run_tiles(x, ws, b_packed, bt, vmem_limit)

    # Ragged batch: copy-free prefix call + tiny padded-tail call (never pads
    # the full array).  Residual cost: the final concat of the two outputs.
    outs = []
    if B_main > 0:
        outs.append(_run_tiles(x[:B_main], ws, b_packed, bt, vmem_limit))
    tail = B - B_main                      # 0 < tail < bt
    tail_p = _round_up(tail, _ALIGN)
    x_tail = jnp.pad(x[B_main:], ((0, tail_p - tail), (0, 0)))
    out_tail = _run_tiles(x_tail, ws, b_packed, tail_p, vmem_limit)[:tail]
    outs.append(out_tail)
    return outs[0] if len(outs) == 1 else jnp.concatenate(outs, axis=0)


def init_params(key):
    """Deterministic init mimicking torch.nn.Linear default (U[-1/sqrt(fan_in), +])."""
    params = []
    for (din, dout, _) in LAYERS:
        key, kw, kb = jax.random.split(key, 3)
        bound = 1.0 / (din ** 0.5)
        w = jax.random.uniform(kw, (din, dout), jnp.float32, -bound, bound)
        b = jax.random.uniform(kb, (1, dout), jnp.float32, -bound, bound)
        params += [w, b]
    return params


def reference_forward(x, params):
    """Pure-JAX reference of the original (unfused) 6-layer chain."""
    h = x
    for li, (_, _, relu) in enumerate(LAYERS):
        h = h @ params[2 * li] + params[2 * li + 1]
        if relu:
            h = jnp.maximum(h, 0.0)
    return h


if __name__ == "__main__":
    key = jax.random.PRNGKey(0)
    key, kx1, kx2 = jax.random.split(key, 3)
    params = init_params(key)
    prepared = prepare_params(params)        # hoisted: computed once, reused below

    # 1) aligned batch -> single call, multi-step "parallel" grid (both v7x TCs busy)
    x1 = jax.random.normal(kx1, (64, 64), dtype=jnp.float32)
    out1 = jax.block_until_ready(autoencoder_forward(x1, prepared))
    ref1 = reference_forward(x1, params)
    assert out1.shape == (64, 64)
    assert jnp.allclose(out1, ref1, atol=1e-4, rtol=1e-4), "f32 aligned mismatch"

    # 2) ragged (odd) batch -> copy-free prefix call + tiny padded-tail call
    x2 = x1[:37]
    out2 = jax.block_until_ready(autoencoder_forward(x2, prepared))
    ref2 = reference_forward(x2, params)
    assert out2.shape == (37, 64)
    assert jnp.allclose(out2, ref2, atol=1e-4, rtol=1e-4), "f32 ragged mismatch"

    # 3) bf16 activation I/O (2x HBM-traffic saving); weights / accumulation stay f32
    x3 = jax.random.normal(kx2, (128, 64), dtype=jnp.float32)
    out3 = jax.block_until_ready(
        autoencoder_forward(x3, prepared, io_dtype=jnp.bfloat16))
    ref3 = reference_forward(x3, params)
    assert out3.shape == (128, 64)
    assert jnp.allclose(out3.astype(jnp.float32), ref3, atol=0.1, rtol=0.1), \
        "bf16 I/O mismatch"

    print("KERNEL_OK")
</pallas_src>

<mosaic_0001>
module attributes {stable_mosaic.version = 11 : i64} {
  func.func @_ae_kernel(%arg0: i32, %arg1: memref<16x128xf32, #tpu.memory_space<vmem>>, %arg2: memref<128x64xf32, #tpu.memory_space<vmem>>, %arg3: memref<64x32xf32, #tpu.memory_space<vmem>>, %arg4: memref<32x32xf32, #tpu.memory_space<vmem>>, %arg5: memref<32x64xf32, #tpu.memory_space<vmem>>, %arg6: memref<64x128xf32, #tpu.memory_space<vmem>>, %arg7: memref<8x128xf32, #tpu.memory_space<vmem>>, %arg8: memref<16x128xf32, #tpu.memory_space<vmem>>) attributes {dimension_semantics = [#tpu.dimension_semantics<parallel>], iteration_bounds = array<i64: 2>, scalar_prefetch = 0 : i64, scratch_operands = 0 : i64, tpu.core_type = #tpu.core_type<tc>, window_params = [{transform_indices = @transform_0, window_bounds = array<i64: 16, 128>}, {pipeline_mode = #tpu.pipeline_mode<synchronous>, transform_indices = @transform_1, window_bounds = array<i64: 128, 64>}, {pipeline_mode = #tpu.pipeline_mode<synchronous>, transform_indices = @transform_2, window_bounds = array<i64: 64, 32>}, {pipeline_mode = #tpu.pipeline_mode<synchronous>, transform_indices = @transform_3, window_bounds = array<i64: 32, 32>}, {pipeline_mode = #tpu.pipeline_mode<synchronous>, transform_indices = @transform_4, window_bounds = array<i64: 32, 64>}, {pipeline_mode = #tpu.pipeline_mode<synchronous>, transform_indices = @transform_5, window_bounds = array<i64: 64, 128>}, {pipeline_mode = #tpu.pipeline_mode<synchronous>, transform_indices = @transform_6, window_bounds = array<i64: 8, 128>}, {transform_indices = @transform_7, window_bounds = array<i64: 16, 128>}]} {
    %c0 = arith.constant 0 : index
    %c0_0 = arith.constant 0 : index
    %0 = vector.load %arg1[%c0, %c0_0] : memref<16x128xf32, #tpu.memory_space<vmem>>, vector<16x128xf32>
    %c0_1 = arith.constant 0 : index
    %c0_2 = arith.constant 0 : index
    %1 = vector.load %arg2[%c0_1, %c0_2] : memref<128x64xf32, #tpu.memory_space<vmem>>, vector<128x64xf32>
    %c0_3 = arith.constant 0 : index
    %c0_4 = arith.constant 0 : index
    %2 = vector.load %arg7[%c0_3, %c0_4] : memref<8x128xf32, #tpu.memory_space<vmem>>, vector<1x64xf32>
    %cst = arith.constant dense<0.000000e+00> : vector<16x64xf32>
    %3 = tpu.matmul %0, %1, %cst {dimension_numbers = #tpu.dot_dimension_numbers<[1], [0], [0], [1], [0, 0, 1, 1], [], []>} : vector<16x128xf32>, vector<128x64xf32>, vector<16x64xf32> -> vector<16x64xf32>
    %4 = vector.broadcast %2 : vector<1x64xf32> to vector<16x64xf32>
    %5 = arith.addf %3, %4 : vector<16x64xf32>
    %cst_5 = arith.constant 0.000000e+00 : f32
    %6 = vector.broadcast %cst_5 : f32 to vector<16x64xf32>
    %7 = arith.maximumf %5, %6 : vector<16x64xf32>
    %c0_6 = arith.constant 0 : index
    %c0_7 = arith.constant 0 : index
    %8 = vector.load %arg3[%c0_6, %c0_7] : memref<64x32xf32, #tpu.memory_space<vmem>>, vector<64x32xf32>
    %c1 = arith.constant 1 : index
    %c0_8 = arith.constant 0 : index
    %9 = vector.load %arg7[%c1, %c0_8] : memref<8x128xf32, #tpu.memory_space<vmem>>, vector<1x32xf32>
    %cst_9 = arith.constant dense<0.000000e+00> : vector<16x32xf32>
    %10 = tpu.matmul %7, %8, %cst_9 {dimension_numbers = #tpu.dot_dimension_numbers<[1], [0], [0], [1], [0, 0, 1, 1], [], []>} : vector<16x64xf32>, vector<64x32xf32>, vector<16x32xf32> -> vector<16x32xf32>
    %11 = vector.broadcast %9 : vector<1x32xf32> to vector<16x32xf32>
    %12 = arith.addf %10, %11 : vector<16x32xf32>
    %cst_10 = arith.constant 0.000000e+00 : f32
    %13 = vector.broadcast %cst_10 : f32 to vector<16x32xf32>
    %14 = arith.maximumf %12, %13 : vector<16x32xf32>
    %c0_11 = arith.constant 0 : index
    %c0_12 = arith.constant 0 : index
    %15 = vector.load %arg4[%c0_11, %c0_12] : memref<32x32xf32, #tpu.memory_space<vmem>>, vector<32x32xf32>
    %c2 = arith.constant 2 : index
    %c0_13 = arith.constant 0 : index
    %16 = vector.load %arg7[%c2, %c0_13] : memref<8x128xf32, #tpu.memory_space<vmem>>, vector<1x32xf32>
    %cst_14 = arith.constant dense<0.000000e+00> : vector<16x32xf32>
    %17 = tpu.matmul %14, %15, %cst_14 {dimension_numbers = #tpu.dot_dimension_numbers<[1], [0], [0], [1], [0, 0, 1, 1], [], []>} : vector<16x32xf32>, vector<32x32xf32>, vector<16x32xf32> -> vector<16x32xf32>
    %18 = vector.broadcast %16 : vector<1x32xf32> to vector<16x32xf32>
    %19 = arith.addf %17, %18 : vector<16x32xf32>
    %cst_15 = arith.constant 0.000000e+00 : f32
    %20 = vector.broadcast %cst_15 : f32 to vector<16x32xf32>
    %21 = arith.maximumf %19, %20 : vector<16x32xf32>
    %c0_16 = arith.constant 0 : index
    %c0_17 = arith.constant 0 : index
    %22 = vector.load %arg5[%c0_16, %c0_17] : memref<32x64xf32, #tpu.memory_space<vmem>>, vector<32x64xf32>
    %c3 = arith.constant 3 : index
    %c0_18 = arith.constant 0 : index
    %23 = vector.load %arg7[%c3, %c0_18] : memref<8x128xf32, #tpu.memory_space<vmem>>, vector<1x64xf32>
    %cst_19 = arith.constant dense<0.000000e+00> : vector<16x64xf32>
    %24 = tpu.matmul %21, %22, %cst_19 {dimension_numbers = #tpu.dot_dimension_numbers<[1], [0], [0], [1], [0, 0, 1, 1], [], []>} : vector<16x32xf32>, vector<32x64xf32>, vector<16x64xf32> -> vector<16x64xf32>
    %25 = vector.broadcast %23 : vector<1x64xf32> to vector<16x64xf32>
    %26 = arith.addf %24, %25 : vector<16x64xf32>
    %cst_20 = arith.constant 0.000000e+00 : f32
    %27 = vector.broadcast %cst_20 : f32 to vector<16x64xf32>
    %28 = arith.maximumf %26, %27 : vector<16x64xf32>
    %c0_21 = arith.constant 0 : index
    %c0_22 = arith.constant 0 : index
    %29 = vector.load %arg6[%c0_21, %c0_22] : memref<64x128xf32, #tpu.memory_space<vmem>>, vector<64x128xf32>
    %c4 = arith.constant 4 : index
    %c0_23 = arith.constant 0 : index
    %30 = vector.load %arg7[%c4, %c0_23] : memref<8x128xf32, #tpu.memory_space<vmem>>, vector<1x128xf32>
    %cst_24 = arith.constant dense<0.000000e+00> : vector<16x128xf32>
    %31 = tpu.matmul %28, %29, %cst_24 {dimension_numbers = #tpu.dot_dimension_numbers<[1], [0], [0], [1], [0, 0, 1, 1], [], []>} : vector<16x64xf32>, vector<64x128xf32>, vector<16x128xf32> -> vector<16x128xf32>
    %32 = vector.broadcast %30 : vector<1x128xf32> to vector<16x128xf32>
    %33 = arith.addf %31, %32 : vector<16x128xf32>
    %cst_25 = arith.constant 0.000000e+00 : f32
    %34 = vector.broadcast %cst_25 : f32 to vector<16x128xf32>
    %35 = arith.maximumf %33, %34 : vector<16x128xf32>
    %c0_26 = arith.constant 0 : index
    %c0_27 = arith.constant 0 : index
    %36 = vector.load %arg8[%c0_26, %c0_27] : memref<16x128xf32, #tpu.memory_space<vmem>>, vector<16x128xf32>
    tpu.vector_store %arg8[%c0_26, %c0_27], %35 {strides = array<i32>} : memref<16x128xf32, #tpu.memory_space<vmem>>, vector<16x128xf32>,
    return
  }
  func.func @transform_0(%arg0: i32) -> (i32, i32) {
    %c0_i32 = arith.constant 0 : i32
    %c0_i32_0 = arith.constant 0 : i32
    return %arg0, %c0_i32 : i32, i32
  }
  func.func @transform_1(%arg0: i32) -> (i32, i32) {
    %c0_i32 = arith.constant 0 : i32
    %c0_i32_0 = arith.constant 0 : i32
    %c0_i32_1 = arith.constant 0 : i32
    return %c0_i32, %c0_i32_0 : i32, i32
  }
  func.func @transform_2(%arg0: i32) -> (i32, i32) {
    %c0_i32 = arith.constant 0 : i32
    %c0_i32_0 = arith.constant 0 : i32
    %c0_i32_1 = arith.constant 0 : i32
    return %c0_i32, %c0_i32_0 : i32, i32
  }
  func.func @transform_3(%arg0: i32) -> (i32, i32) {
    %c0_i32 = arith.constant 0 : i32
    %c0_i32_0 = arith.constant 0 : i32
    %c0_i32_1 = arith.constant 0 : i32
    return %c0_i32, %c0_i32_0 : i32, i32
  }
  func.func @transform_4(%arg0: i32) -> (i32, i32) {
    %c0_i32 = arith.constant 0 : i32
    %c0_i32_0 = arith.constant 0 : i32
    %c0_i32_1 = arith.constant 0 : i32
    return %c0_i32, %c0_i32_0 : i32, i32
  }
  func.func @transform_5(%arg0: i32) -> (i32, i32) {
    %c0_i32 = arith.constant 0 : i32
    %c0_i32_0 = arith.constant 0 : i32
    %c0_i32_1 = arith.constant 0 : i32
    return %c0_i32, %c0_i32_0 : i32, i32
  }
  func.func @transform_6(%arg0: i32) -> (i32, i32) {
    %c0_i32 = arith.constant 0 : i32
    %c0_i32_0 = arith.constant 0 : i32
    %c0_i32_1 = arith.constant 0 : i32
    return %c0_i32, %c0_i32_0 : i32, i32
  }
  func.func @transform_7(%arg0: i32) -> (i32, i32) {
    %c0_i32 = arith.constant 0 : i32
    %c0_i32_0 = arith.constant 0 : i32
    return %arg0, %c0_i32 : i32, i32
  }
}

</mosaic_0001>

<bundles_post_ra>
// kernel: tpu_custom_call.1
= control target key start
LH: loop header
LB: loop body
LE: loop exit
PB: predicated region body
PF: predicated region fallthrough
CT: control target
= control target key end

     0   :  { %12 = vsyncpa [#allocation3], 0  ;;  %s1484_s0 = inlined_call_operand.vmem [shape: f32[32,128], index: 0, kind: input, shape index: {}]   ;;  %s1485_s1 = inlined_call_operand.vmem [shape: f32[128,64], index: 1, kind: input, shape index: {}]   ;;  %s1486_s2 = inlined_call_operand.vmem [shape: f32[64,32], index: 2, kind: input, shape index: {}]   ;;  %s1487_s3 = inlined_call_operand.vmem [shape: f32[32,32], index: 3, kind: input, shape index: {}]   ;;  %s1488_s4 = inlined_call_operand.vmem [shape: f32[32,64], index: 4, kind: input, shape index: {}]   ;;  %s1489_s5 = inlined_call_operand.vmem [shape: f32[64,128], index: 5, kind: input, shape index: {}]   ;;  %s1490_s6 = inlined_call_operand.vmem [shape: f32[8,128], index: 6, kind: input, shape index: {}]   ;;  %s1491_s7 = inlined_call_operand.hbm [shape: f32[32,128], index: 7, kind: output, shape index: {}]  }
   0x1   :  { %14 = vsyncpa [#allocation3 + $0x1], 0  ;;  %s1235_s24 = smov 0   ;;  %s1237_s25 = smov 0  }
   0x2   :  { %s1239_s26 = smov 0   ;;  %s1241_s27 = smov 0  }
   0x3 LB: > { %s1256_s28 = sadd.s32 4294967295, %s1190_s27   ;;  %s836_s29 = sadd.s32 4294967294, %s1190_s27   ;;  %s1190_s27 = sphi %s1241_s27, %s1497_s27   ;;  %s1186_s26 = sphi %s1239_s26, %s1496_s26   ;;  %s1182_s25 = sphi %s1237_s25, %s1495_s25   ;;  %s1178_s24 = sphi %s1235_s24, %s1494_s24  }
   0x4   : > { %s1260_s30 = sadd.s32 1, %s1190_s27   ;;  %s179_s8 = sadd.s32 1, %s1186_s26 }
   0x5   : > { %s176_s9 = ssub.s32 %s1190_s27, %s1260_s30  ;;  %p189_p0 = scmp.ne.s32.totalorder %s1186_s26, %s1182_s25 }
   0x6   : > { %p177_p1 = scmp.eq.s32.totalorder %s176_s9, 0  ;;  %p190_p2 = scmp.eq.s32.totalorder %s1256_s28, 1 }
   0x7   : > { %p195_p3 = scmp.ne.s32.totalorder %s1182_s25, %s1178_s24  ;;  %p196_p4 = scmp.eq.s32.totalorder %s836_s29, 1 }
   0x8   : > { %s1271_s10 = scalar_select %p177_p1, %s1186_s26, %s179_s8  }
   0x9   : > { %p1273_p5 = por %p190_p2, %p189_p0  ;;  %p1277_p6 = por %p196_p4, %p195_p3 }
   0xa   : > { %p839_p7 = scmp.ge.s32.totalorder %s1190_s27, 1  ;;  %p241_p8 = scmp.lt.s32.totalorder %s1190_s27, 3 }
   0xc   : > { %p242_p9 = pnand %p839_p7, %p241_p8 }
   0xd   : > { %v282_v0 = vld [vmem:[%s1485_s1] sm:$0xff] (!%p242_p9)  ;;  %v283_v1 = vld [vmem:[%s1485_s1 + $0x8] sm:$0xff] (!%p242_p9)  ;;  %v284_v2 = vld [vmem:[%s1485_s1 + $0x10] sm:$0xff] (!%p242_p9)  ;;  %s841_s19 = sshll.u32 (!%p242_p9), %s1256_s28, 1  ;;  %vm393_vm0 = vcmask (!%p242_p9), 523264   ;;  %vm486_vm1 = vcmask (!%p242_p9), 261120  }
   0xe   : > { %245 = sbr.rel (%p242_p9) target bundleno = 1152 (0x480), region = 48  ;;  %v1007_v3 = vpack.c.bf16 (!%p242_p9), %v283_v1, %v282_v0  ;;  %v285_v4 = vld [vmem:[%s1485_s1 + $0x18] sm:$0xff] (!%p242_p9)  ;;  %p274_p10 = scmp.lt.s32.totalorder (!%p242_p9), %s841_s19, 3  ;;  %v286_v6 = vld [vmem:[%s1485_s1 + $0x20] sm:$0xff] (!%p242_p9)  ;;  %v287_v7 = vld [vmem:[%s1485_s1 + $0x28] sm:$0xff] (!%p242_p9) }
   0xf   : > { %v1011_v5 = vpack.c.bf16 (!%p242_p9), %v285_v4, %v284_v2  ;;  %v1015_v8 = vpack.c.bf16 (!%p242_p9), %v287_v7, %v286_v6  ;;  %v288_v9 = vld [vmem:[%s1485_s1 + $0x30] sm:$0xff] (!%p242_p9)  ;;  %v380_v10 = vld [vmem:[%s1486_s2] sm:$0xff] (!%p242_p9)  ;;  %v381_v11 = vld [vmem:[%s1486_s2 + $0x8] sm:$0xff] (!%p242_p9)  ;;  %s1192_s21 = smov (!%p242_p9), [#allocation2]  }
  0x10   : > { %1008 = vmatprep.subr.bf16.mxu0 (!%p242_p9), %v1007_v3  ;;  %v289_v12 = vld [vmem:[%s1485_s1 + $0x38] sm:$0xff] (!%p242_p9)  ;;  %v1039_v13 = vpack.c.bf16 (!%p242_p9), %v381_v11, %v380_v10  ;;  %v382_v14 = vld [vmem:[%s1486_s2 + $0x10] sm:$0xff] (!%p242_p9)  ;;  %v384_v18 = vld [vmem:[%s1486_s2 + $0x20] sm:$0xff] (!%p242_p9)  ;;  %s1132_s22 = sshll.u32 (!%p242_p9), %s1192_s21, 4  ;;  %s1133_s22 = int_to_ptr.vmem [resolvable:$false] %s1132_s22 }
  0x11   : > { %1010 = vmatpush3.bf16.msra.mxu0 (!%p242_p9), %v1007_v3  ;;  %v383_v15 = vld [vmem:[%s1486_s2 + $0x18] sm:$0xff] (!%p242_p9)  ;;  %v385_v19 = vld [vmem:[%s1486_s2 + $0x28] sm:$0xff] (!%p242_p9)  ;;  %v1019_v20 = vpack.c.bf16 (!%p242_p9), %v289_v12, %v288_v9  ;;  %v290_v21 = vld [vmem:[%s1485_s1 + $0x40] sm:$0xff] (!%p242_p9)  ;;  %s1134_s23 = scalar_lea.vmem (!%p242_p9), %s1133_s22, 512 }
  0x12   : > { %1012 = vmatprep.subr.bf16.mxu0 (!%p242_p9), %v1011_v5  ;;  %v1043_v17 = vpack.c.bf16 (!%p242_p9), %v383_v15, %v382_v14  ;;  %1040 = vmatprep.subr.bf16.mxu1 (!%p242_p9), %v1039_v13  ;;  %v291_v22 = vld [vmem:[%s1485_s1 + $0x48] sm:$0xff] (!%p242_p9)  ;;  %v1047_v23 = vpack.c.bf16 (!%p242_p9), %v385_v19, %v384_v18  ;;  %v292_v25 = vld [vmem:[%s1485_s1 + $0x50] sm:$0xff] (!%p242_p9)  ;;  %v293_v26 = vld [vmem:[%s1485_s1 + $0x58] sm:$0xff] (!%p242_p9) }
  0x13   : > { %1042 = vmatpush3.bf16.msra.mxu1 (!%p242_p9), %v1039_v13  ;;  %v1023_v24 = vpack.c.bf16 (!%p242_p9), %v291_v22, %v290_v21  ;;  %v1027_v27 = vpack.c.bf16 (!%p242_p9), %v293_v26, %v292_v25  ;;  %v294_v28 = vld [vmem:[%s1485_s1 + $0x60] sm:$0xff] (!%p242_p9)  ;;  %v295_v29 = vld [vmem:[%s1485_s1 + $0x68] sm:$0xff] (!%p242_p9)  ;;  %v296_v31 = vld [vmem:[%s1485_s1 + $0x70] sm:$0xff] (!%p242_p9) }
  0x14   : > { %1044 = vmatprep.subr.bf16.mxu1 (!%p242_p9), %v1043_v17  ;;  %v1031_v30 = vpack.c.bf16 (!%p242_p9), %v295_v29, %v294_v28  ;;  %v297_v32 = vld [vmem:[%s1485_s1 + $0x78] sm:$0xff] (!%p242_p9)  ;;  %v386_v35 = vld [vmem:[%s1486_s2 + $0x30] sm:$0xff] (!%p242_p9)  ;;  %v477_v38 = vld [vmem:[%s1487_s3] sm:$0xff] (!%p242_p9) }
  0x15   : > { %s1499_s19 = smov (!%p274_p10, %s841_s19), 3  ;;  %1014 = vmatpush3.bf16.msra.mxu0 %v1011_v5  ;;  %v1035_v33 = vpack.c.bf16 %v297_v32, %v296_v31  ;;  %v387_v36 = vld [vmem:[%s1486_s2 + $0x38] sm:$0xff]  ;;  %v478_v39 = vld [vmem:[%s1487_s3 + $0x8] sm:$0xff]  ;;  %v843_v41 = vld [vmem:[%s1490_s6] ss:$0 sm:$0xff] }
  0x16   : > { %s842_s14 = sshll.u32 %s1499_s19, 3  ;;  %1016 = vmatprep.subr.bf16.mxu0 %v1015_v8  ;;  %v1051_v37 = vpack.c.bf16 %v387_v36, %v386_v35  ;;  %v1055_v40 = vpack.c.bf16 %v478_v39, %v477_v38  ;;  %v479_v48 = vld [vmem:[%s1487_s3 + $0x10] sm:$0xff]  ;;  %v480_v49 = vld [vmem:[%s1487_s3 + $0x18] sm:$0xff]  ;;  %v570_v51 = vld [vmem:[%s1488_s4] sm:$0xff]  ;;  %s270_s19 = sand.u32 1, %s1182_s25  }
  0x17   : > { %s1317_s29 = scalar_lea.vmem %s1484_s0, %s842_s14  ;;  %1046 = vmatpush3.bf16.msra.mxu1 %v1043_v17  ;;  %v1059_v50 = vpack.c.bf16 %v480_v49, %v479_v48  ;;  %v571_v52 = vld [vmem:[%s1488_s4 + $0x8] sm:$0xff]  ;;  %v844_v54 = vld [vmem:[%s1490_s6 + $0x1] ss:$0 sm:$0xff]  ;;  %v572_v61 = vld [vmem:[%s1488_s4 + $0x10] sm:$0xff]  ;;  %s840_s8 = sshll.u32 %s270_s19, 4 }
  0x18   : > { %v280_v16 = vld [vmem:[%s1317_s29] sm:$0xff]  ;;  %1048 = vmatprep.subr.bf16.mxu1 %v1047_v23  ;;  %v281_v34 = vld [vmem:[%s1317_s29 + $0x8] sm:$0xff]  ;;  %v1063_v53 = vpack.c.bf16 %v571_v52, %v570_v51  ;;  %v573_v62 = vld [vmem:[%s1488_s4 + $0x18] sm:$0xff]  ;;  %s272_s15 = scalar_lea.vmem [#allocation2], %s840_s8  ;;  %s861_s29 = sshll.u32 %s1256_s28, 8 }
  0x19   : > { %944 = vmatprep.mubr.f32.mxu0 %v280_v16  ;;  %1018 = vmatpush3.bf16.msra.mxu0 %v1015_v8  ;;  %v1067_v63 = vpack.c.bf16 %v573_v62, %v572_v61  ;;  %v662_v0 = vld [vmem:[%s1489_s5] sm:$0xff]  ;;  %v663_v1 = vld [vmem:[%s1489_s5 + $0x8] sm:$0xff]  ;;  %v664_v2 = vld [vmem:[%s1489_s5 + $0x10] sm:$0xff]  ;;  %s774_s16 = sshll.u32 %s272_s15, 4  ;;  %s1441_s18 = scalar_lea.hbm %s1491_s7, %s861_s29  ;;  %s1436_s16 = int_to_ptr.vmem [resolvable:$true] %s774_s16 }
  0x1a   : > { %1020 = vmatprep.subr.bf16.mxu0 %v1019_v20  ;;  %v1071_v3 = vpack.c.bf16 %v663_v1, %v662_v0  ;;  %v665_v4 = vld [vmem:[%s1489_s5 + $0x18] sm:$0xff]  ;;  %v666_v6 = vld [vmem:[%s1489_s5 + $0x20] sm:$0xff]  ;;  %v667_v7 = vld [vmem:[%s1489_s5 + $0x28] sm:$0xff]  ;;  %s1443_s20 = scalar_lea.sflag [#allocation3], %s270_s19  ;;  %s1128_s28 = scalar_lea.vmem %s1436_s16, 256 }
  0x1b   : > { %1050 = vmatpush3.bf16.msra.mxu1 %v1047_v23  ;;  %v1075_v5 = vpack.c.bf16 %v665_v4, %v664_v2  ;;  %v1079_v8 = vpack.c.bf16 %v667_v7, %v666_v6  ;;  %v847_v9 = vld [vmem:[%s1490_s6 + $0x2] ss:$0 sm:$0xff]  ;;  %v668_v16 = vld [vmem:[%s1489_s5 + $0x30] sm:$0xff]  ;;  %v669_v17 = vld [vmem:[%s1489_s5 + $0x38] sm:$0xff]  ;;  %p1129_p11 = scmp.ne.s32.totalorder %s1436_s16, %s1128_s28  ;;  %p1135_p0 = scmp.lt.s32.totalorder %s1436_s16, %s1133_s22 }
  0x1c   : > { %1052 = vmatprep.subr.bf16.mxu1 %v1051_v37  ;;  %v1083_v18 = vpack.c.bf16 %v669_v17, %v668_v16  ;;  %v850_v19 = vld [vmem:[%s1490_s6 + $0x3] ss:$0 sm:$0xff]  ;;  %v853_v26 = vld [vmem:[%s1490_s6 + $0x4] ss:$0 sm:$0xff]  ;;  %p1136_p1 = scmp.lt.s32.totalorder %s1134_s23, %s1128_s28 }
  0x1d   : > { %1022 = vmatpush3.bf16.msra.mxu0 %v1019_v20  ;;  %p1130_p12 = pnand %p1129_p11, %p1273_p5 }
  0x1e   : > { %1024 = vmatprep.subr.bf16.mxu0 %v1023_v24  ;;  %p1137_p2 = por %p1136_p1, %p1135_p0 }
  0x1f   : > { %1054 = vmatpush3.bf16.msra.mxu1 %v1051_v37  ;;  %p1131_p13 = pneg %p1130_p12 }
  0x20   : > { %1056 = vmatprep.subr.bf16.mxu1 %v1055_v40 }
  0x21   : > { %1026 = vmatpush3.bf16.msra.mxu0 %v1023_v24  ;;  %p1138_p3 = pnand %p1137_p2, %p1131_p13 }
  0x22   : > { %1028 = vmatprep.subr.bf16.mxu0 %v1027_v27 }
  0x25   : > { %1030 = vmatpush3.bf16.msra.mxu0 %v1027_v27 }
  0x26   : > { %1032 = vmatprep.subr.bf16.mxu0 %v1031_v30 }
  0x29   : > { %1034 = vmatpush3.bf16.msra.mxu0 %v1031_v30 }
  0x2a   : > { %1036 = vmatprep.subr.bf16.mxu0 %v1035_v33 }
  0x2d   : > { %1038 = vmatpush3.bf16.msra.mxu0 %v1035_v33 }
  0x2e   : > { %1072 = vmatprep.subr.bf16.mxu0 %v1071_v3 }
  0x30   : > { %945 = vmatmul.mubr.f32.vlgmr.msra.gmra.mrb[0].mxu0 %v281_v34 }
  0x31   : > { %1074 = vmatpush3.bf16.msra.mxu0 %v1071_v3 }
  0x32   : > { %1076 = vmatprep.subr.bf16.mxu0 %v1075_v5 }
  0x35   : > { %1078 = vmatpush3.bf16.msra.mxu0 %v1075_v5 }
  0x36   : > { %1080 = vmatprep.subr.bf16.mxu0 %v1079_v8 }
  0x39   : > { %1082 = vmatpush3.bf16.msra.mxu0 %v1079_v8 }
  0x3a   : > { %1084 = vmatprep.subr.bf16.mxu0 %v1083_v18 }
  0x3d   : > { %1086 = vmatpush3.bf16.msra.mxu0 %v1083_v18 }
 0x103   : > { %v946_v42 = vpop.f32.mrb[0].mxu0 }
 0x104   : > { %v375_v43 = vadd.f32 %v946_v42, %v843_v41  ;;  %v369_v44 = vpop.f32.mrb[1].mxu0 }
 0x105   : > { %v370_v45 = vadd.f32 %v843_v41, %v369_v44 }
 0x106   : > { %v379_v47 = vmax.f32 %v375_v43, 0.0 }
 0x107   : > { %v378_v46 = vmax.f32 %v370_v45, 0.0 }
 0x109   : > { %963 = vmatprep.mubr.msk.f32.mxu1 %vm393_vm0, %v378_v46 }
 0x10a   : > { %964 = vmatmul.mubr.msk.f32.vlgmr.msra.gmra.mrb[0].mxu1 %vm393_vm0, %v379_v47 }
 0x10b   : > { %1058 = vmatpush3.bf16.msra.mxu1 %v1055_v40 }
 0x10c   : > { %1060 = vmatprep.subr.bf16.mxu1 %v1059_v50 }
 0x10f   : > { %1062 = vmatpush3.bf16.msra.mxu1 %v1059_v50 }
 0x110   : > { %1064 = vmatprep.subr.bf16.mxu1 %v1063_v53 }
 0x1dd   : > { %v965_v55 = vpop.f32.mrb[0].mxu1 }
 0x1de   : > { %v472_v56 = vadd.f32 %v965_v55, %v844_v54  ;;  %v466_v57 = vpop.f32.mrb[1].mxu1 }
 0x1df   : > { %v467_v58 = vadd.f32 %v844_v54, %v466_v57 }
 0x1e0   : > { %v476_v60 = vmax.f32 %v472_v56, 0.0 }
 0x1e1   : > { %v475_v59 = vmax.f32 %v467_v58, 0.0 }
 0x1e3   : > { %974 = vmatprep.mubr.msk.f32.mxu1 %vm486_vm1, %v475_v59 }
 0x1e4   : > { %975 = vmatmul.mubr.msk.f32.vlgmr.msra.gmra.mrb[2].mxu1 %vm486_vm1, %v476_v60 }
 0x1e5   : > { %1066 = vmatpush3.bf16.msra.mxu1 %v1063_v53 }
 0x1e6   : > { %1068 = vmatprep.subr.bf16.mxu1 %v1067_v63 }
 0x1e9   : > { %1070 = vmatpush3.bf16.msra.mxu1 %v1067_v63 }
 0x2b7   : > { %v976_v10 = vpop.f32.mrb[2].mxu1 }
 0x2b8   : > { %v565_v11 = vadd.f32 %v976_v10, %v847_v9  ;;  %v559_v12 = vpop.f32.mrb[3].mxu1 }
 0x2b9   : > { %v560_v13 = vadd.f32 %v847_v9, %v559_v12 }
 0x2ba   : > { %v569_v15 = vmax.f32 %v565_v11, 0.0 }
 0x2bb   : > { %v568_v14 = vmax.f32 %v560_v13, 0.0 }
 0x2bd   : > { %985 = vmatprep.mubr.msk.f32.mxu1 %vm486_vm1, %v568_v14 }
 0x2be   : > { %986 = vmatmul.mubr.msk.f32.vlgmr.msra.gmra.mrb[4].mxu1 %vm486_vm1, %v569_v15 }
 0x391   : > { %v987_v20 = vpop.f32.mrb[4].mxu1 }
 0x392   : > { %v657_v21 = vadd.f32 %v987_v20, %v850_v19  ;;  %v651_v22 = vpop.f32.mrb[5].mxu1 }
 0x393   : > { %v652_v23 = vadd.f32 %v850_v19, %v651_v22 }
 0x394   : > { %v661_v25 = vmax.f32 %v657_v21, 0.0 }
 0x395   : > { %v660_v24 = vmax.f32 %v652_v23, 0.0 }
 0x397   : > { %1004 = vmatprep.mubr.msk.f32.mxu0 %vm393_vm0, %v660_v24 }
 0x398   : > { %1005 = vmatmul.mubr.msk.f32.vlgmr.msra.gmra.mrb[2].mxu0 %vm393_vm0, %v661_v25 }
 0x46b   : > { %v1006_v27 = vpop.f32.mrb[2].mxu0 }
 0x46c   : > { %v753_v28 = vadd.f32 %v1006_v27, %v853_v26  ;;  %v747_v29 = vpop.f32.mrb[3].mxu0 }
 0x46d   : > { %v748_v30 = vadd.f32 %v853_v26, %v747_v29 }
 0x46e   : > { %v757_v31 = vmax.f32 %v753_v28, 0.0 }
 0x46f   : > { %v756_v32 = vmax.f32 %v748_v30, 0.0 }
 0x470   : > { %759 = vst [vmem:[%s272_s15 + $0x8] sm:$0xff] %v757_v31 }
 0x471   : > { %758 = vst [vmem:[%s272_s15] sm:$0xff] %v756_v32 }
 0x472   : > { %1141 = shalt.err (!%p1138_p3)
}
 0x473   : > { %s1142_s19 = scalar_lea.hbm %s1441_s18, 256  ;;  %s1146_s13 = scalar_lea.hbm %s1491_s7, 512 }
 0x474   : > { %p1143_p4 = scmp.ne.s32.totalorder %s1441_s18, %s1142_s19  ;;  %p1147_p9 = scmp.lt.u32.totalorder %s1441_s18, %s1491_s7 }
 0x475   : > { %p1148_p10 = scmp.lt.u32.totalorder %s1146_s13, %s1142_s19  ;;  %p1150_p12 = scmp.lt.u32.totalorder %s1142_s19, %s1441_s18 }
 0x476   : > { %p1144_p7 = pnand %p1143_p4, %p1273_p5 }
 0x477   : > { %p1149_p11 = por %p1148_p10, %p1147_p9 }
 0x478   : > { %p1145_p8 = pneg %p1144_p7 }
 0x479   : > { %p1151_p13 = por %p1150_p12, %p1149_p11 }
 0x47b   : > { %p1152_p0 = pnand %p1151_p13, %p1145_p8 }
 0x47d   : > { %1155 = shalt.err (!%p1152_p0)
}
 0x47e   : > { %s1193_s14 = smov 128   ;;  %s1194_s17 = smov 8  }
 0x47f   : > { %1087 = dma.vmem_to_hbm [thread:$0]  (%p1273_p5), %s1436_s16, 256, %s1441_s18, %s1443_s20, %s1193_s14, %s1193_s14, %s1194_s17  }
 0x480 PF: > { %p1093_p1 = scmp.ge.s32.totalorder %s1190_s27, 2  ;;  %s789_s28 = sand.u32 1, %s1178_s24  }
 0x481   : > { %s790_s21 = scalar_lea.sflag [#allocation3], %s789_s28 }
 0x482   : > { %p1090_p2 = pnand %p1093_p1, %p1277_p6 }
 0x484   : > { %1173 = dma.done.wait (!%p1090_p2), %s790_s21, 256  }
 0x485   : > { %1175 = vsyncadd (!%p1090_p2), %s790_s21, 4294967040  ;;  %p17_p3 = scmp.ge.s32.totalorder %s1260_s30, 4   ;;  %s1494_s24 = smov %s1182_s25 }
 0x486   : > { %s1495_s25 = smov %s1186_s26  ;;  %s1496_s26 = smov %s1271_s10 }
 0x487   : > { %s1497_s27 = smov %s1260_s30  ;;  %19 = sbr.rel (!%p17_p3) target bundleno = 3 (0x3), region = 83 }
 0x48e   :  { %795 = vsyncpa [#allocation3], 1 }
 0x48f   :  { %797 = vsyncpa [#allocation3 + $0x1], 1 }

</bundles_post_ra>
